<compile_context>
chip_gen: v7x
topology: tpu7x:2x2x1
jax: 0.10.0
libtpu: 0.0.40
codegen_flags: <defaults>
</compile_context>

<pallas_src>
import jax
import jax.numpy as jnp
from jax.experimental import pallas as pl
from jax.experimental.pallas import tpu as pltpu

MOMENTUM = 0.985
EPS = 1e-5


def normalizer_kernel(x_ref, ma_ref, mv_ref, scale_ref, bias_ref,
                      y_ref, new_ma_ref, new_mv_ref):
    x = x_ref[...].astype(jnp.float32)          # (1, C, T)
    C = x.shape[1]
    T = x.shape[2]

    # --- channel normalization (dim=1); torch.std default is unbiased (ddof=1).
    # Sublane (XLU) reductions; the only full-tensor ops are a subtract, a
    # square, and a multiply by the small (1,1,T) reciprocal.
    mean_c = jnp.mean(x, axis=1, keepdims=True)                          # (1, 1, T)
    centered = x - mean_c
    var_c = jnp.sum(centered * centered, axis=1, keepdims=True) * (1.0 / (C - 1))
    inv_std_c = 1.0 / (jnp.sqrt(var_c) + EPS)                            # small (1,1,T)
    x_cn = centered * inv_std_c                                          # (1, C, T)

    # --- time-axis stats of x_cn in a single sweep (lane/XLU reductions) ---
    inv_T = 1.0 / T
    mean_t = jnp.sum(x_cn, axis=2, keepdims=True) * inv_T                # (1, C, 1)
    meansq_t = jnp.sum(x_cn * x_cn, axis=2, keepdims=True) * inv_T       # (1, C, 1)

    # --- moving-statistic update (all on tiny (1,C,1) vectors) ---
    ma_new = MOMENTUM * ma_ref[...].astype(jnp.float32) + (1.0 - MOMENTUM) * mean_t
    # E[(x - ma)^2] = E[x^2] - 2*ma*E[x] + ma^2  (one-pass form)
    new_var = meansq_t - 2.0 * ma_new * mean_t + ma_new * ma_new
    mv_new = MOMENTUM * mv_ref[...].astype(jnp.float32) + (1.0 - MOMENTUM) * new_var

    # --- fold moving-stat normalization + affine into one apply pass ---
    inv_mv = 1.0 / (jnp.sqrt(mv_new) + EPS)                              # small (1,C,1)
    s_eff = jnp.abs(scale_ref[...].astype(jnp.float32)) * inv_mv         # small (1,C,1)
    b_eff = bias_ref[...].astype(jnp.float32) - ma_new * s_eff           # small (1,C,1)

    y_ref[...] = (x_cn * s_eff + b_eff).astype(y_ref.dtype)              # single FMA pass
    new_ma_ref[...] = ma_new.astype(new_ma_ref.dtype)
    new_mv_ref[...] = mv_new.astype(new_mv_ref.dtype)


def normalizer_forward(x, moving_avg, moving_var, scale, bias):
    """x: (N, C, T); moving_avg/var/scale/bias: (1, C, 1)."""
    N, C, T = x.shape

    # VMEM budget: input + output blocks are double-buffered (4 * slab) plus
    # in-kernel f32 temporaries.  Cap below v7x's 64 MiB physical VMEM.
    # TODO(synk): for slabs that do not fit this budget a T-tiled two-pass
    # (stat accumulation + apply) schedule is required.
    slab_bytes = C * T * jnp.dtype(x.dtype).itemsize
    f32_slab = C * T * 4
    vmem_budget = min(56 << 20, max(32 << 20, 4 * slab_bytes + 6 * f32_slab + (2 << 20)))

    param_spec = pl.BlockSpec((1, C, 1), lambda n: (0, 0, 0))
    # Note: block shapes equal full array extents on the last two dims, so the
    # (8,128) divisibility constraint does not apply.  For best store
    # throughput T should be a multiple of 128; the (N,C,1) stat outputs are
    # tiny width-1 stores and not performance relevant.
    return pl.pallas_call(
        normalizer_kernel,
        out_shape=(
            jax.ShapeDtypeStruct((N, C, T), x.dtype),
            jax.ShapeDtypeStruct((N, C, 1), jnp.float32),  # updated movingAverage
            jax.ShapeDtypeStruct((N, C, 1), jnp.float32),  # updated movingVariance
        ),
        grid=(N,),
        in_specs=[
            pl.BlockSpec((1, C, T), lambda n: (n, 0, 0)),
            param_spec,  # movingAverage
            param_spec,  # movingVariance
            param_spec,  # BatchNormScale
            param_spec,  # BatchNormBias
        ],
        out_specs=(
            pl.BlockSpec((1, C, T), lambda n: (n, 0, 0)),
            pl.BlockSpec((1, C, 1), lambda n: (n, 0, 0)),
            pl.BlockSpec((1, C, 1), lambda n: (n, 0, 0)),
        ),
        compiler_params=pltpu.CompilerParams(
            dimension_semantics=("parallel",),
            vmem_limit_bytes=int(vmem_budget),
        ),
    )(x, moving_avg, moving_var, scale, bias)


def normalizer_reference(x, moving_avg, moving_var, scale, bias):
    """Pure-JAX reference mirroring the PyTorch training-mode forward (two-pass)."""
    x = x.astype(jnp.float32)
    C = x.shape[1]
    mean_c = jnp.mean(x, axis=1, keepdims=True)
    std_c = jnp.sqrt(jnp.sum((x - mean_c) ** 2, axis=1, keepdims=True) / (C - 1))
    x = (x - mean_c) / (std_c + EPS)
    new_mean = jnp.mean(x, axis=2, keepdims=True)
    ma = MOMENTUM * moving_avg + (1.0 - MOMENTUM) * new_mean
    x = x - ma
    new_var = jnp.mean(x ** 2, axis=2, keepdims=True)
    mv = MOMENTUM * moving_var + (1.0 - MOMENTUM) * new_var
    x = x / (jnp.sqrt(mv) + EPS)
    x = x * jnp.abs(scale) + bias
    return x, ma, mv


if __name__ == "__main__":
    N, C, T = 2, 4, 16
    key = jax.random.PRNGKey(0)
    kx, ks, kb = jax.random.split(key, 3)

    x = jax.random.normal(kx, (N, C, T), dtype=jnp.float32)

    # Deterministic parameter init (shapes from __init__); small perturbations so
    # abs(scale)/bias actually do something.
    moving_avg = jnp.zeros((1, C, 1), dtype=jnp.float32)
    moving_var = jnp.ones((1, C, 1), dtype=jnp.float32)
    scale = jnp.ones((1, C, 1), dtype=jnp.float32) + 0.1 * jax.random.normal(ks, (1, C, 1))
    bias = 0.1 * jax.random.normal(kb, (1, C, 1))

    y, new_ma, new_mv = normalizer_forward(x, moving_avg, moving_var, scale, bias)
    jax.block_until_ready((y, new_ma, new_mv))

    y_ref, ma_ref, mv_ref = normalizer_reference(x, moving_avg, moving_var, scale, bias)
    assert jnp.allclose(y, y_ref, atol=1e-5, rtol=1e-5)
    assert jnp.allclose(new_ma, ma_ref, atol=1e-6, rtol=1e-6)
    assert jnp.allclose(new_mv, mv_ref, atol=1e-6, rtol=1e-6)

    print("KERNEL_OK")
</pallas_src>

<mosaic_0001>
module attributes {stable_mosaic.version = 11 : i64} {
  func.func @normalizer_kernel(%arg0: i32, %arg1: memref<1x4x16xf32, #tpu.memory_space<vmem>>, %arg2: memref<1x4x1xf32, #tpu.memory_space<vmem>>, %arg3: memref<1x4x1xf32, #tpu.memory_space<vmem>>, %arg4: memref<1x4x1xf32, #tpu.memory_space<vmem>>, %arg5: memref<1x4x1xf32, #tpu.memory_space<vmem>>, %arg6: memref<1x4x16xf32, #tpu.memory_space<vmem>>, %arg7: memref<1x4x1xf32, #tpu.memory_space<vmem>>, %arg8: memref<1x4x1xf32, #tpu.memory_space<vmem>>) attributes {dimension_semantics = [#tpu.dimension_semantics<parallel>], iteration_bounds = array<i64: 2>, scalar_prefetch = 0 : i64, scratch_operands = 0 : i64, tpu.core_type = #tpu.core_type<tc>, window_params = [{transform_indices = @transform_0, window_bounds = array<i64: 1, 4, 16>}, {pipeline_mode = #tpu.pipeline_mode<synchronous>, transform_indices = @transform_1, window_bounds = array<i64: 1, 4, 1>}, {pipeline_mode = #tpu.pipeline_mode<synchronous>, transform_indices = @transform_2, window_bounds = array<i64: 1, 4, 1>}, {pipeline_mode = #tpu.pipeline_mode<synchronous>, transform_indices = @transform_3, window_bounds = array<i64: 1, 4, 1>}, {pipeline_mode = #tpu.pipeline_mode<synchronous>, transform_indices = @transform_4, window_bounds = array<i64: 1, 4, 1>}, {transform_indices = @transform_5, window_bounds = array<i64: 1, 4, 16>}, {transform_indices = @transform_6, window_bounds = array<i64: 1, 4, 1>}, {transform_indices = @transform_7, window_bounds = array<i64: 1, 4, 1>}]} {
    %c0 = arith.constant 0 : index
    %c0_0 = arith.constant 0 : index
    %c0_1 = arith.constant 0 : index
    %0 = vector.load %arg1[%c0, %c0_0, %c0_1] : memref<1x4x16xf32, #tpu.memory_space<vmem>>, vector<1x4x16xf32>
    %cst = arith.constant dense<0.000000e+00> : vector<1x16xf32>
    %1 = vector.multi_reduction <add>, %0, %cst [1] : vector<1x4x16xf32> to vector<1x16xf32>
    %2 = vector.shape_cast %1 : vector<1x16xf32> to vector<1x1x16xf32>
    %cst_2 = arith.constant 4.000000e+00 : f32
    %3 = vector.broadcast %cst_2 : f32 to vector<1x1x16xf32>
    %4 = arith.divf %2, %3 : vector<1x1x16xf32>
    %5 = vector.broadcast %4 : vector<1x1x16xf32> to vector<1x4x16xf32>
    %6 = arith.subf %0, %5 : vector<1x4x16xf32>
    %7 = arith.mulf %6, %6 : vector<1x4x16xf32>
    %cst_3 = arith.constant dense<0.000000e+00> : vector<1x16xf32>
    %8 = vector.multi_reduction <add>, %7, %cst_3 [1] : vector<1x4x16xf32> to vector<1x16xf32>
    %9 = vector.shape_cast %8 : vector<1x16xf32> to vector<1x1x16xf32>
    %cst_4 = arith.constant 0.333333343 : f32
    %10 = vector.broadcast %cst_4 : f32 to vector<1x1x16xf32>
    %11 = arith.mulf %9, %10 : vector<1x1x16xf32>
    %12 = math.sqrt %11 : vector<1x1x16xf32>
    %cst_5 = arith.constant 9.99999974E-6 : f32
    %13 = vector.broadcast %cst_5 : f32 to vector<1x1x16xf32>
    %14 = arith.addf %12, %13 : vector<1x1x16xf32>
    %cst_6 = arith.constant 1.000000e+00 : f32
    %15 = vector.broadcast %cst_6 : f32 to vector<1x1x16xf32>
    %16 = arith.divf %15, %14 : vector<1x1x16xf32>
    %17 = vector.broadcast %16 : vector<1x1x16xf32> to vector<1x4x16xf32>
    %18 = arith.mulf %6, %17 : vector<1x4x16xf32>
    %cst_7 = arith.constant dense<0.000000e+00> : vector<1x4xf32>
    %19 = vector.multi_reduction <add>, %18, %cst_7 [2] : vector<1x4x16xf32> to vector<1x4xf32>
    %20 = vector.shape_cast %19 : vector<1x4xf32> to vector<1x4x1xf32>
    %cst_8 = arith.constant 6.250000e-02 : f32
    %21 = vector.broadcast %cst_8 : f32 to vector<1x4x1xf32>
    %22 = arith.mulf %20, %21 : vector<1x4x1xf32>
    %23 = arith.mulf %18, %18 : vector<1x4x16xf32>
    %cst_9 = arith.constant dense<0.000000e+00> : vector<1x4xf32>
    %24 = vector.multi_reduction <add>, %23, %cst_9 [2] : vector<1x4x16xf32> to vector<1x4xf32>
    %25 = vector.shape_cast %24 : vector<1x4xf32> to vector<1x4x1xf32>
    %cst_10 = arith.constant 6.250000e-02 : f32
    %26 = vector.broadcast %cst_10 : f32 to vector<1x4x1xf32>
    %27 = arith.mulf %25, %26 : vector<1x4x1xf32>
    %c0_11 = arith.constant 0 : index
    %c0_12 = arith.constant 0 : index
    %c0_13 = arith.constant 0 : index
    %28 = vector.load %arg2[%c0_11, %c0_12, %c0_13] : memref<1x4x1xf32, #tpu.memory_space<vmem>>, vector<1x4x1xf32>
    %cst_14 = arith.constant 9.850000e-01 : f32
    %29 = vector.broadcast %cst_14 : f32 to vector<1x4x1xf32>
    %30 = arith.mulf %29, %28 : vector<1x4x1xf32>
    %cst_15 = arith.constant 1.500000e-02 : f32
    %31 = vector.broadcast %cst_15 : f32 to vector<1x4x1xf32>
    %32 = arith.mulf %31, %22 : vector<1x4x1xf32>
    %33 = arith.addf %30, %32 : vector<1x4x1xf32>
    %cst_16 = arith.constant 2.000000e+00 : f32
    %34 = vector.broadcast %cst_16 : f32 to vector<1x4x1xf32>
    %35 = arith.mulf %34, %33 : vector<1x4x1xf32>
    %36 = arith.mulf %35, %22 : vector<1x4x1xf32>
    %37 = arith.subf %27, %36 : vector<1x4x1xf32>
    %38 = arith.mulf %33, %33 : vector<1x4x1xf32>
    %39 = arith.addf %37, %38 : vector<1x4x1xf32>
    %c0_17 = arith.constant 0 : index
    %c0_18 = arith.constant 0 : index
    %c0_19 = arith.constant 0 : index
    %40 = vector.load %arg3[%c0_17, %c0_18, %c0_19] : memref<1x4x1xf32, #tpu.memory_space<vmem>>, vector<1x4x1xf32>
    %cst_20 = arith.constant 9.850000e-01 : f32
    %41 = vector.broadcast %cst_20 : f32 to vector<1x4x1xf32>
    %42 = arith.mulf %41, %40 : vector<1x4x1xf32>
    %cst_21 = arith.constant 1.500000e-02 : f32
    %43 = vector.broadcast %cst_21 : f32 to vector<1x4x1xf32>
    %44 = arith.mulf %43, %39 : vector<1x4x1xf32>
    %45 = arith.addf %42, %44 : vector<1x4x1xf32>
    %46 = math.sqrt %45 : vector<1x4x1xf32>
    %cst_22 = arith.constant 9.99999974E-6 : f32
    %47 = vector.broadcast %cst_22 : f32 to vector<1x4x1xf32>
    %48 = arith.addf %46, %47 : vector<1x4x1xf32>
    %cst_23 = arith.constant 1.000000e+00 : f32
    %49 = vector.broadcast %cst_23 : f32 to vector<1x4x1xf32>
    %50 = arith.divf %49, %48 : vector<1x4x1xf32>
    %c0_24 = arith.constant 0 : index
    %c0_25 = arith.constant 0 : index
    %c0_26 = arith.constant 0 : index
    %51 = vector.load %arg4[%c0_24, %c0_25, %c0_26] : memref<1x4x1xf32, #tpu.memory_space<vmem>>, vector<1x4x1xf32>
    %52 = math.absf %51 : vector<1x4x1xf32>
    %53 = arith.mulf %52, %50 : vector<1x4x1xf32>
    %c0_27 = arith.constant 0 : index
    %c0_28 = arith.constant 0 : index
    %c0_29 = arith.constant 0 : index
    %54 = vector.load %arg5[%c0_27, %c0_28, %c0_29] : memref<1x4x1xf32, #tpu.memory_space<vmem>>, vector<1x4x1xf32>
    %55 = arith.mulf %33, %53 : vector<1x4x1xf32>
    %56 = arith.subf %54, %55 : vector<1x4x1xf32>
    %57 = vector.broadcast %53 : vector<1x4x1xf32> to vector<1x4x16xf32>
    %58 = arith.mulf %18, %57 : vector<1x4x16xf32>
    %59 = vector.broadcast %56 : vector<1x4x1xf32> to vector<1x4x16xf32>
    %60 = arith.addf %58, %59 : vector<1x4x16xf32>
    %c0_30 = arith.constant 0 : index
    %c0_31 = arith.constant 0 : index
    %c0_32 = arith.constant 0 : index
    %61 = vector.load %arg6[%c0_30, %c0_31, %c0_32] : memref<1x4x16xf32, #tpu.memory_space<vmem>>, vector<1x4x16xf32>
    tpu.vector_store %arg6[%c0_30, %c0_31, %c0_32], %60 {strides = array<i32>} : memref<1x4x16xf32, #tpu.memory_space<vmem>>, vector<1x4x16xf32>,
    %c0_33 = arith.constant 0 : index
    %c0_34 = arith.constant 0 : index
    %c0_35 = arith.constant 0 : index
    %62 = vector.load %arg7[%c0_33, %c0_34, %c0_35] : memref<1x4x1xf32, #tpu.memory_space<vmem>>, vector<1x4x1xf32>
    tpu.vector_store %arg7[%c0_33, %c0_34, %c0_35], %33 {strides = array<i32>} : memref<1x4x1xf32, #tpu.memory_space<vmem>>, vector<1x4x1xf32>,
    %c0_36 = arith.constant 0 : index
    %c0_37 = arith.constant 0 : index
    %c0_38 = arith.constant 0 : index
    %63 = vector.load %arg8[%c0_36, %c0_37, %c0_38] : memref<1x4x1xf32, #tpu.memory_space<vmem>>, vector<1x4x1xf32>
    tpu.vector_store %arg8[%c0_36, %c0_37, %c0_38], %45 {strides = array<i32>} : memref<1x4x1xf32, #tpu.memory_space<vmem>>, vector<1x4x1xf32>,
    return
  }
  func.func @transform_0(%arg0: i32) -> (i32, i32, i32) {
    %c0_i32 = arith.constant 0 : i32
    %c0_i32_0 = arith.constant 0 : i32
    %c0_i32_1 = arith.constant 0 : i32
    return %arg0, %c0_i32, %c0_i32_0 : i32, i32, i32
  }
  func.func @transform_1(%arg0: i32) -> (i32, i32, i32) {
    %c0_i32 = arith.constant 0 : i32
    %c0_i32_0 = arith.constant 0 : i32
    %c0_i32_1 = arith.constant 0 : i32
    %c0_i32_2 = arith.constant 0 : i32
    return %c0_i32, %c0_i32_0, %c0_i32_1 : i32, i32, i32
  }
  func.func @transform_2(%arg0: i32) -> (i32, i32, i32) {
    %c0_i32 = arith.constant 0 : i32
    %c0_i32_0 = arith.constant 0 : i32
    %c0_i32_1 = arith.constant 0 : i32
    %c0_i32_2 = arith.constant 0 : i32
    return %c0_i32, %c0_i32_0, %c0_i32_1 : i32, i32, i32
  }
  func.func @transform_3(%arg0: i32) -> (i32, i32, i32) {
    %c0_i32 = arith.constant 0 : i32
    %c0_i32_0 = arith.constant 0 : i32
    %c0_i32_1 = arith.constant 0 : i32
    %c0_i32_2 = arith.constant 0 : i32
    return %c0_i32, %c0_i32_0, %c0_i32_1 : i32, i32, i32
  }
  func.func @transform_4(%arg0: i32) -> (i32, i32, i32) {
    %c0_i32 = arith.constant 0 : i32
    %c0_i32_0 = arith.constant 0 : i32
    %c0_i32_1 = arith.constant 0 : i32
    %c0_i32_2 = arith.constant 0 : i32
    return %c0_i32, %c0_i32_0, %c0_i32_1 : i32, i32, i32
  }
  func.func @transform_5(%arg0: i32) -> (i32, i32, i32) {
    %c0_i32 = arith.constant 0 : i32
    %c0_i32_0 = arith.constant 0 : i32
    %c0_i32_1 = arith.constant 0 : i32
    return %arg0, %c0_i32, %c0_i32_0 : i32, i32, i32
  }
  func.func @transform_6(%arg0: i32) -> (i32, i32, i32) {
    %c0_i32 = arith.constant 0 : i32
    %c0_i32_0 = arith.constant 0 : i32
    %c0_i32_1 = arith.constant 0 : i32
    return %arg0, %c0_i32, %c0_i32_0 : i32, i32, i32
  }
  func.func @transform_7(%arg0: i32) -> (i32, i32, i32) {
    %c0_i32 = arith.constant 0 : i32
    %c0_i32_0 = arith.constant 0 : i32
    %c0_i32_1 = arith.constant 0 : i32
    return %arg0, %c0_i32, %c0_i32_0 : i32, i32, i32
  }
}

</mosaic_0001>

<bundles_post_ra>
// kernel: tpu_custom_call.1
= control target key start
LH: loop header
LB: loop body
LE: loop exit
PB: predicated region body
PF: predicated region fallthrough
CT: control target
= control target key end

     0   :  { %13 = vsyncpa [#allocation3], 0  ;;  %s814_s0 = inlined_call_operand.vmem [shape: f32[2,4,16], index: 0, kind: input, shape index: {}]   ;;  %s815_s1 = inlined_call_operand.vmem [shape: f32[1,4,1], index: 1, kind: input, shape index: {}]   ;;  %s816_s2 = inlined_call_operand.vmem [shape: f32[1,4,1], index: 2, kind: input, shape index: {}]   ;;  %s817_s3 = inlined_call_operand.vmem [shape: f32[1,4,1], index: 3, kind: input, shape index: {}]   ;;  %s818_s4 = inlined_call_operand.vmem [shape: f32[1,4,1], index: 4, kind: input, shape index: {}]   ;;  %s819_s5 = inlined_call_operand.hbm [shape: f32[2,4,16], index: 5, kind: output, shape index: {0}]   ;;  %s820_s6 = inlined_call_operand.vmem [shape: f32[2,4,1], index: 6, kind: output, shape index: {1}]   ;;  %s821_s7 = inlined_call_operand.vmem [shape: f32[2,4,1], index: 7, kind: output, shape index: {2}]  }
   0x1   :  { %15 = vsyncpa [#allocation3 + $0x1], 0  ;;  %s684_s24 = smov 0   ;;  %s686_s25 = smov 0  }
   0x2   :  { %s688_s26 = smov 0   ;;  %s690_s27 = smov 0  }
   0x3 LB: > { %s705_s28 = sadd.s32 4294967295, %s640_s27   ;;  %s516_s29 = sadd.s32 4294967294, %s640_s27   ;;  %s640_s27 = sphi %s690_s27, %s827_s27   ;;  %s636_s26 = sphi %s688_s26, %s826_s26   ;;  %s632_s25 = sphi %s686_s25, %s825_s25   ;;  %s628_s24 = sphi %s684_s24, %s824_s24  }
   0x4   : > { %s709_s30 = sadd.s32 1, %s640_s27   ;;  %s138_s8 = sadd.s32 1, %s636_s26 }
   0x5   : > { %s135_s9 = ssub.s32 %s640_s27, %s709_s30  ;;  %p148_p0 = scmp.ne.s32.totalorder %s636_s26, %s632_s25 }
   0x6   : > { %p136_p1 = scmp.eq.s32.totalorder %s135_s9, 0  ;;  %p149_p2 = scmp.eq.s32.totalorder %s705_s28, 1 }
   0x7   : > { %p154_p3 = scmp.ne.s32.totalorder %s632_s25, %s628_s24  ;;  %p155_p4 = scmp.eq.s32.totalorder %s516_s29, 1 }
   0x8   : > { %s720_s10 = scalar_select %p136_p1, %s636_s26, %s138_s8  }
   0x9   : > { %p722_p5 = por %p149_p2, %p148_p0  ;;  %p726_p6 = por %p155_p4, %p154_p3 }
   0xa   : > { %p519_p7 = scmp.ge.s32.totalorder %s640_s27, 1  ;;  %p244_p8 = scmp.lt.s32.totalorder %s640_s27, 3 }
   0xc   : > { %p245_p9 = pnand %p519_p7, %p244_p8 }
   0xd   : > { %p283_p10 = scmp.lt.s32.totalorder (!%p245_p9), %s705_s28, 1  ;;  %vm296_vm0 = vcmask (!%p245_p9), 125952   ;;  %v642_v30 = vmov (!%p245_p9), 0   ;;  %v336_v31 = vld [vmem:[%s815_s1] sm:$0xf] (!%p245_p9)  ;;  %vm378_vm3 = vcmask (!%p245_p9), 3072  }
   0xe   : > { %248 = sbr.rel (%p245_p9) target bundleno = 429 (0x1ad), region = 40  ;;  %568 = vset.pattern.permute.xlu1 (!%p245_p9), %v642_v30  ;;  %569 = vset.pattern.permute.xlu0 (!%p245_p9), %v642_v30  ;;  %v337_v33 = vmul.f32 (!%p245_p9), 0.985, %v336_v31  ;;  %v345_v41 = vld [vmem:[%s816_s2] sm:$0xf] (!%p245_p9)  ;;  %s268_s18 = sand.u32 (!%p245_p9), 1, %s632_s25  }
   0xf   : > { %v346_v44 = vmul.f32 (!%p245_p9), 0.985, %v345_v41  ;;  %v359_v54 = vld [vmem:[%s817_s3] sm:$0xf] (!%p245_p9)  ;;  %s520_s19 = sshll.u32 (!%p245_p9), %s268_s18, 2  ;;  %s525_s20 = sshll.u32 (!%p245_p9), %s705_s28, 6 }
  0x10   : > { %v360_v55 = vand.u32 (!%p245_p9), 2147483647, %v359_v54  ;;  %v362_v58 = vld [vmem:[%s818_s4] sm:$0xf] (!%p245_p9)  ;;  %s270_s21 = scalar_lea.vmem (!%p245_p9), [#allocation2], %s520_s19  ;;  %s771_s8 = scalar_lea.hbm (!%p245_p9), %s819_s5, %s525_s20 }
  0x11   : > { %s382_s9 = scalar_lea.sflag (!%p245_p9), [#allocation3], %s268_s18 }
  0x15   : > { %s284_s13 = scalar_select %p283_p10, %s705_s28, 1 }
  0x16   : > { %s643_s28 = smov [#allocation2]  }
  0x17   : > { %s734_s14 = sshll.u32 %s284_s13, 2  ;;  %s582_s15 = sshll.u32 %s643_s28, 4  ;;  %s583_s15 = int_to_ptr.vmem [resolvable:$false] %s582_s15 }
  0x18   : > { %s286_s17 = scalar_lea.vmem %s814_s0, %s734_s14  ;;  %s290_s22 = scalar_lea.vmem %s820_s6, %s734_s14 }
  0x19   : > { %v295_v0 = vld [vmem:[%s286_s17] sm:$0xf]  ;;  %s294_s13 = scalar_lea.vmem %s821_s7, %s734_s14  ;;  %s584_s16 = scalar_lea.vmem %s583_s15, 128 }
  0x1a   : > { %v297_v1 = vsel %vm296_vm0, %v295_v0, 0.0 }
  0x1b   : > { %v298_v2 = vrot.slane %v297_v1, 4 }
  0x1d   : > { %v299_v3 = vadd.f32 %v298_v2, %v297_v1 }
  0x1f   : > { %v300_v4 = vrot.slane %v299_v3, 2 }
  0x21   : > { %v301_v5 = vadd.f32 %v300_v4, %v299_v3 }
  0x23   : > { %v302_v6 = vrot.slane %v301_v5, 1 }
  0x25   : > { %v303_v7 = vadd.f32 %v302_v6, %v301_v5 }
  0x27   : > { %v305_v8 = vmul.f32 0.25, %v303_v7 }
  0x29   : > { %v306_v9 = vsub.f32 %v295_v0, %v305_v8 }
  0x2b   : > { %v307_v10 = vmul.f32 %v306_v9, %v306_v9 }
  0x2d   : > { %v308_v11 = vsel %vm296_vm0, %v307_v10, 0.0 }
  0x2e   : > { %v309_v12 = vrot.slane %v308_v11, 4 }
  0x30   : > { %v310_v13 = vadd.f32 %v309_v12, %v308_v11 }
  0x32   : > { %v311_v14 = vrot.slane %v310_v13, 2 }
  0x34   : > { %v312_v15 = vadd.f32 %v311_v14, %v310_v13 }
  0x36   : > { %v313_v16 = vrot.slane %v312_v15, 1 }
  0x38   : > { %v314_v17 = vadd.f32 %v313_v16, %v312_v15 }
  0x3a   : > { %v315_v18 = vmul.f32 0.33333334, %v314_v17 }
  0x3c   : > { %570 = vrsqrt.f32 %v315_v18  ;;  %vm318_vm1 = vcmp.eq.f32.partialorder %v315_v18, inf  ;;  %v321_v20 = vand.u32 2147483648, %v315_v18  ;;  %vm320_vm2 = vcmp.eq.f32.partialorder %v315_v18, 0.0 }
  0x46   : > { %v571_v19 = vpop.eup %570 }
  0x47   : > { %v317_v21 = vmul.f32 %v571_v19, %v315_v18 }
  0x49   : > { %v319_v22 = vsel %vm318_vm1, %v315_v18, %v317_v21 }
  0x4a   : > { %v322_v23 = vsel %vm320_vm2, %v321_v20, %v319_v22 }
  0x4b   : > { %v323_v24 = vadd.f32 1e-05, %v322_v23 }
  0x4d   : > { %572 = vrcp.f32 %v323_v24 }
  0x57   : > { %v573_v25 = vpop.eup %572 }
  0x58   : > { %v326_v26 = vmul.f32 %v573_v25, %v306_v9 }
  0x5a   : > { %v327_v27 = vsel %vm296_vm0, %v326_v26, 0.0  ;;  %v331_v28 = vmul.f32 %v326_v26, %v326_v26 }
  0x5b   : > { %328 = vadd.xlane.f32.xlu0 %v327_v27 }
  0x5c   : > { %v332_v29 = vsel %vm296_vm0, %v331_v28, 0.0 }
  0x5f   : > { %333 = vadd.xlane.f32.xlu0 %v332_v29 }
  0xe8   : > { %v329_v32 = vpop.xlane.xlu0 %328 }
  0xe9   : > { %v330_v34 = vmul.f32 0.0625, %v329_v32 }
  0xeb   : > { %v338_v35 = vmul.f32 0.015, %v330_v34 }
  0xec   : > { %v334_v36 = vpop.xlane.xlu0 %333 }
  0xed   : > { %v339_v37 = vadd.f32 %v338_v35, %v337_v33  ;;  %v335_v39 = vmul.f32 0.0625, %v334_v36 }
  0xef   : > { %v340_v38 = vmul.f32 2.0, %v339_v37  ;;  %379 = vst.msk [vmem:[%s290_s22] sm:$0xf] %vm378_vm3, %v339_v37  ;;  %v343_v42 = vmul.f32 %v339_v37, %v339_v37  ;;  %s403_s22 = sshll.u32 %s270_s21, 4  ;;  %s773_s22 = int_to_ptr.vmem [resolvable:$true] %s403_s22 }
  0xf0   : > { %p585_p0 = scmp.lt.s32.totalorder %s773_s22, %s583_s15 }
  0xf1   : > { %v341_v40 = vmul.f32 %v340_v38, %v330_v34 }
  0xf3   : > { %v342_v43 = vsub.f32 %v335_v39, %v341_v40 }
  0xf5   : > { %v344_v45 = vadd.f32 %v343_v42, %v342_v43 }
  0xf7   : > { %v347_v46 = vmul.f32 0.015, %v344_v45 }
  0xf9   : > { %v348_v47 = vadd.f32 %v347_v46, %v346_v44 }
  0xfb   : > { %574 = vrsqrt.f32 %v348_v47  ;;  %380 = vst.msk [vmem:[%s294_s13] sm:$0xf] %vm378_vm3, %v348_v47  ;;  %vm351_vm4 = vcmp.eq.f32.partialorder %v348_v47, inf  ;;  %v354_v50 = vand.u32 2147483648, %v348_v47  ;;  %vm353_vm5 = vcmp.eq.f32.partialorder %v348_v47, 0.0  ;;  %s578_s13 = scalar_lea.vmem %s773_s22, 64 }
  0xfc   : > { %p579_p11 = scmp.ne.s32.totalorder %s773_s22, %s578_s13  ;;  %p586_p1 = scmp.lt.s32.totalorder %s584_s16, %s578_s13 }
  0xfe   : > { %p580_p12 = pnand %p579_p11, %p722_p5  ;;  %p587_p2 = por %p586_p1, %p585_p0 }
 0x100   : > { %p581_p13 = pneg %p580_p12 }
 0x102   : > { %p588_p3 = pnand %p587_p2, %p581_p13 }
 0x105   : > { %v575_v48 = vpop.eup %574 }
 0x106   : > { %v350_v49 = vmul.f32 %v575_v48, %v348_v47 }
 0x108   : > { %v352_v51 = vsel %vm351_vm4, %v348_v47, %v350_v49 }
 0x109   : > { %v355_v52 = vsel %vm353_vm5, %v354_v50, %v352_v51 }
 0x10a   : > { %v356_v53 = vadd.f32 1e-05, %v355_v52 }
 0x10c   : > { %576 = vrcp.f32 %v356_v53 }
 0x116   : > { %v577_v56 = vpop.eup %576 }
 0x117   : > { %v361_v57 = vmul.f32 %v577_v56, %v360_v55 }
 0x119   : > { %367 = vperm.xlu1 %568, %v361_v57   ;;  %v363_v59 = vmul.f32 %v361_v57, %v339_v37 }
 0x11b   : > { %v364_v60 = vsub.f32 %v362_v58, %v363_v59 }
 0x11d   : > { %373 = vperm.xlu1 %568, %v364_v60  }
 0x198   : > { %v368_v61 = vpop.permute.xlu1 %367 }
 0x199   : > { %v370_v62 = vmul.f32 %v368_v61, %v326_v26 }
 0x19c   : > { %v374_v63 = vpop.permute.xlu1 %373 }
 0x19d   : > { %v376_v0 = vadd.f32 %v374_v63, %v370_v62 }
 0x19f   : > { %377 = vst.msk [vmem:[%s270_s21] sm:$0xf] %vm296_vm0, %v376_v0 }
 0x1a0   : > { %591 = shalt.err (!%p588_p3)
}
 0x1a1   : > { %s592_s14 = scalar_lea.hbm %s771_s8, 64  ;;  %s596_s19 = scalar_lea.hbm %s819_s5, 128 }
 0x1a2   : > { %p593_p4 = scmp.ne.s32.totalorder %s771_s8, %s592_s14  ;;  %p597_p9 = scmp.lt.u32.totalorder %s771_s8, %s819_s5 }
 0x1a3   : > { %p598_p10 = scmp.lt.u32.totalorder %s596_s19, %s592_s14  ;;  %p600_p12 = scmp.lt.u32.totalorder %s592_s14, %s771_s8 }
 0x1a4   : > { %p594_p7 = pnand %p593_p4, %p722_p5 }
 0x1a5   : > { %p599_p11 = por %p598_p10, %p597_p9 }
 0x1a6   : > { %p595_p8 = pneg %p594_p7 }
 0x1a7   : > { %p601_p13 = por %p600_p12, %p599_p11 }
 0x1a9   : > { %p602_p0 = pnand %p601_p13, %p595_p8 }
 0x1ab   : > { %605 = shalt.err (!%p602_p0)
}
 0x1ac   : > { %528 = dma.vmem_to_hbm [thread:$0]  (%p722_p5), %s773_s22, 64, %s771_s8, %s382_s9  }
 0x1ad PF: > { %p534_p1 = scmp.ge.s32.totalorder %s640_s27, 2  ;;  %s421_s23 = sand.u32 1, %s628_s24  }
 0x1ae   : > { %s422_s29 = scalar_lea.sflag [#allocation3], %s421_s23 }
 0x1af   : > { %p531_p2 = pnand %p534_p1, %p726_p6 }
 0x1b1   : > { %623 = dma.done.wait (!%p531_p2), %s422_s29, 64  }
 0x1b2   : > { %625 = vsyncadd (!%p531_p2), %s422_s29, 4294967232  ;;  %p18_p3 = scmp.ge.s32.totalorder %s709_s30, 4   ;;  %s824_s24 = smov %s632_s25 }
 0x1b3   : > { %s825_s25 = smov %s636_s26  ;;  %s826_s26 = smov %s720_s10 }
 0x1b4   : > { %s827_s27 = smov %s709_s30  ;;  %20 = sbr.rel (!%p18_p3) target bundleno = 3 (0x3), region = 99 }
 0x1bb   :  { %441 = vsyncpa [#allocation3], 1 }
 0x1bc   :  { %443 = vsyncpa [#allocation3 + $0x1], 1 }

</bundles_post_ra>
